<compile_context>
chip_gen: v5e
topology: v5e:2x2
jax: 0.10.0
libtpu: 0.0.40
codegen_flags: <defaults>
</compile_context>

<pallas_src>
import functools
import math

import jax
import jax.numpy as jnp
from jax.experimental import pallas as pl
from jax.experimental.pallas import tpu as pltpu


VMEM_LIMIT = 48 * 1024 * 1024  # above scoped defaults, below v7x physical 64 MiB


def _pick_tile(dim, target):
    """Largest legal tile: `target` if it divides `dim`, else the full dim."""
    if dim <= target or dim % target != 0:
        return dim
    return target


def _cparams(semantics):
    return pltpu.CompilerParams(dimension_semantics=semantics,
                                vmem_limit_bytes=VMEM_LIMIT)


# ----------------------- fused RMSNorm + projection --------------------------

def _rmsnorm_matmul_kernel(x_ref, ln_ref, w_ref, o_ref, xn_ref, *, eps):
    # Normalize once per row-tile (j == 0), reuse for every output column tile.
    @pl.when(pl.program_id(1) == 0)
    def _():
        x = x_ref[...].astype(jnp.float32)
        ms = jnp.mean(x * x, axis=-1, keepdims=True)
        xn_ref[...] = (x * jax.lax.rsqrt(ms + eps) *
                       ln_ref[...].astype(jnp.float32)).astype(xn_ref.dtype)

    o_ref[...] = jnp.dot(xn_ref[...], w_ref[...],
                         preferred_element_type=jnp.float32).astype(o_ref.dtype)


def rmsnorm_matmul(x2d, ln_w, w, eps, tm=256, tn=256):
    """o = rmsnorm(x2d) @ w.  x2d:(M,D) bf16, ln_w:(1,D) f32, w:(D,N) bf16."""
    M, D = x2d.shape
    _, N = w.shape
    tm = _pick_tile(M, tm)
    tn = _pick_tile(N, tn)
    grid = (M // tm, N // tn)
    return pl.pallas_call(
        functools.partial(_rmsnorm_matmul_kernel, eps=eps),
        out_shape=jax.ShapeDtypeStruct((M, N), x2d.dtype),
        grid_spec=pltpu.PrefetchScalarGridSpec(
            num_scalar_prefetch=0, grid=grid,
            in_specs=[pl.BlockSpec((tm, D), lambda i, j: (i, 0)),
                      pl.BlockSpec((1, D), lambda i, j: (0, 0)),
                      pl.BlockSpec((D, tn), lambda i, j: (0, j))],
            out_specs=pl.BlockSpec((tm, tn), lambda i, j: (i, j)),
            scratch_shapes=[pltpu.VMEM((tm, D), x2d.dtype)]),
        # j carries the normalized-activation scratch -> must stay on one core
        compiler_params=_cparams(("parallel", "arbitrary")),
    )(x2d, ln_w, w)


# ----------------------- tiled linear + fused residual -----------------------

def _linear_residual_kernel(x_ref, w_ref, r_ref, o_ref, acc_ref):
    @pl.when(pl.program_id(2) == 0)
    def _():
        acc_ref[...] = jnp.zeros_like(acc_ref)

    acc_ref[...] += jnp.dot(x_ref[...], w_ref[...],
                            preferred_element_type=jnp.float32)

    @pl.when(pl.program_id(2) == pl.num_programs(2) - 1)
    def _():
        o_ref[...] = (acc_ref[...] +
                      r_ref[...].astype(jnp.float32)).astype(o_ref.dtype)


def linear_residual(x2d, w, residual, tm=256, tn=256, tk=512):
    """o = x2d @ w + residual.  x2d:(M,K), w:(K,N), residual:(M,N)."""
    M, K = x2d.shape
    _, N = w.shape
    tm = _pick_tile(M, tm)
    tn = _pick_tile(N, tn)
    tk = _pick_tile(K, tk)
    grid = (M // tm, N // tn, K // tk)
    return pl.pallas_call(
        _linear_residual_kernel,
        out_shape=jax.ShapeDtypeStruct((M, N), x2d.dtype),
        grid_spec=pltpu.PrefetchScalarGridSpec(
            num_scalar_prefetch=0, grid=grid,
            in_specs=[pl.BlockSpec((tm, tk), lambda i, j, k: (i, k)),
                      pl.BlockSpec((tk, tn), lambda i, j, k: (k, j)),
                      pl.BlockSpec((tm, tn), lambda i, j, k: (i, j))],
            out_specs=pl.BlockSpec((tm, tn), lambda i, j, k: (i, j)),
            scratch_shapes=[pltpu.VMEM((tm, tn), jnp.float32)]),
        compiler_params=_cparams(("parallel", "parallel", "arbitrary")),
    )(x2d, w, residual)


# ----------------------- flash attention (causal, GQA) -----------------------

def _flash_attn_kernel(q_ref, k_ref, v_ref, o_ref, m_sc, l_sc, acc_sc,
                       *, scale, tq, tk):
    qi = pl.program_id(1)
    kv = pl.program_id(2)

    @pl.when(kv == 0)
    def _():
        m_sc[...] = jnp.full_like(m_sc, -jnp.inf)
        l_sc[...] = jnp.zeros_like(l_sc)
        acc_sc[...] = jnp.zeros_like(acc_sc)

    # Skip kv tiles entirely above the causal diagonal.
    @pl.when(kv * tk <= qi * tq + (tq - 1))
    def _():
        q = q_ref[0]
        k = k_ref[0]
        v = v_ref[0]
        s = jax.lax.dot_general(q, k, (((1,), (1,)), ((), ())),
                                preferred_element_type=jnp.float32) * scale
        q_pos = qi * tq + jax.lax.broadcasted_iota(jnp.int32, (tq, tk), 0)
        k_pos = kv * tk + jax.lax.broadcasted_iota(jnp.int32, (tq, tk), 1)
        s = jnp.where(k_pos <= q_pos, s, -jnp.inf)
        m_new = jnp.maximum(m_sc[...], jnp.max(s, axis=-1, keepdims=True))
        alpha = jnp.exp(m_sc[...] - m_new)
        p = jnp.exp(s - m_new)
        l_sc[...] = alpha * l_sc[...] + jnp.sum(p, axis=-1, keepdims=True)
        acc_sc[...] = alpha * acc_sc[...] + jax.lax.dot_general(
            p.astype(v.dtype), v, (((1,), (0,)), ((), ())),
            preferred_element_type=jnp.float32)
        m_sc[...] = m_new

    @pl.when(kv == pl.num_programs(2) - 1)
    def _():
        o_ref[0] = (acc_sc[...] *
                    pl.reciprocal(l_sc[...], approx=True)).astype(o_ref.dtype)


def flash_attention(q, k, v, n_heads, n_kv_heads, scale, tq=256, tk=256):
    """q:(B*H,S,Dh), k/v:(B*KVH,S,Dh) -> (B*H,S,Dh). GQA via index_map."""
    BH, S, Dh = q.shape
    groups = n_heads // n_kv_heads
    tq = _pick_tile(S, tq)
    tk = _pick_tile(S, tk)
    grid = (BH, S // tq, S // tk)

    def kv_index(bh, qi, kv):
        return ((bh // n_heads) * n_kv_heads + (bh % n_heads) // groups, kv, 0)

    return pl.pallas_call(
        functools.partial(_flash_attn_kernel, scale=scale, tq=tq, tk=tk),
        out_shape=jax.ShapeDtypeStruct((BH, S, Dh), q.dtype),
        grid_spec=pltpu.PrefetchScalarGridSpec(
            num_scalar_prefetch=0, grid=grid,
            in_specs=[pl.BlockSpec((1, tq, Dh), lambda bh, qi, kv: (bh, qi, 0)),
                      pl.BlockSpec((1, tk, Dh), kv_index),
                      pl.BlockSpec((1, tk, Dh), kv_index)],
            out_specs=pl.BlockSpec((1, tq, Dh), lambda bh, qi, kv: (bh, qi, 0)),
            scratch_shapes=[pltpu.VMEM((tq, 1), jnp.float32),
                            pltpu.VMEM((tq, 1), jnp.float32),
                            pltpu.VMEM((tq, Dh), jnp.float32)]),
        compiler_params=_cparams(("parallel", "parallel", "arbitrary")),
    )(q, k, v)


# ------------------ fused RMSNorm + SwiGLU MLP + residual --------------------

def _rmsnorm_mlp_kernel(h_ref, ln_ref, wg_ref, wu_ref, wd_ref, o_ref,
                        acc_ref, hn_ref, *, eps):
    it = pl.program_id(1)

    @pl.when(it == 0)
    def _():
        acc_ref[...] = jnp.zeros_like(acc_ref)
        # normalize once per row-tile, reuse for every intermediate tile
        h = h_ref[...].astype(jnp.float32)
        ms = jnp.mean(h * h, axis=-1, keepdims=True)
        hn_ref[...] = (h * jax.lax.rsqrt(ms + eps) *
                       ln_ref[...].astype(jnp.float32)).astype(hn_ref.dtype)

    hn = hn_ref[...]
    g = jnp.dot(hn, wg_ref[...], preferred_element_type=jnp.float32)
    u = jnp.dot(hn, wu_ref[...], preferred_element_type=jnp.float32)
    act = (g * (1.0 / (1.0 + jnp.exp(-g)))) * u          # silu(g) * u, f32
    acc_ref[...] += jnp.dot(act.astype(wd_ref.dtype), wd_ref[...],
                            preferred_element_type=jnp.float32)

    @pl.when(it == pl.num_programs(1) - 1)
    def _():
        o_ref[...] = (acc_ref[...] +
                      h_ref[...].astype(jnp.float32)).astype(o_ref.dtype)


def rmsnorm_mlp(h2d, ln_w, wg, wu, wd, eps, tm=256, ti=256):
    """out = h + down(silu(gate(rmsnorm(h))) * up(rmsnorm(h))), tiled over I."""
    M, D = h2d.shape
    _, I = wg.shape
    tm = _pick_tile(M, tm)
    ti = _pick_tile(I, ti)
    grid = (M // tm, I // ti)
    return pl.pallas_call(
        functools.partial(_rmsnorm_mlp_kernel, eps=eps),
        out_shape=jax.ShapeDtypeStruct((M, D), h2d.dtype),
        grid_spec=pltpu.PrefetchScalarGridSpec(
            num_scalar_prefetch=0, grid=grid,
            in_specs=[pl.BlockSpec((tm, D), lambda i, t: (i, 0)),
                      pl.BlockSpec((1, D), lambda i, t: (0, 0)),
                      pl.BlockSpec((D, ti), lambda i, t: (0, t)),
                      pl.BlockSpec((D, ti), lambda i, t: (0, t)),
                      pl.BlockSpec((ti, D), lambda i, t: (t, 0))],
            out_specs=pl.BlockSpec((tm, D), lambda i, t: (i, 0)),
            scratch_shapes=[pltpu.VMEM((tm, D), jnp.float32),
                            pltpu.VMEM((tm, D), h2d.dtype)]),
        compiler_params=_cparams(("parallel", "arbitrary")),
    )(h2d, ln_w, wg, wu, wd)


# ----------------------- final RMSNorm (tiny) --------------------------------

def _rmsnorm_kernel(x_ref, w_ref, o_ref, *, eps):
    x = x_ref[...].astype(jnp.float32)
    ms = jnp.mean(x * x, axis=-1, keepdims=True)
    o_ref[...] = (x * jax.lax.rsqrt(ms + eps) *
                  w_ref[...].astype(jnp.float32)).astype(o_ref.dtype)


def rmsnorm(x2d, w_row, eps):
    M, D = x2d.shape
    return pl.pallas_call(
        functools.partial(_rmsnorm_kernel, eps=eps),
        out_shape=jax.ShapeDtypeStruct((M, D), x2d.dtype),
        in_specs=[pl.BlockSpec(memory_space=pltpu.MemorySpace.VMEM),
                  pl.BlockSpec(memory_space=pltpu.MemorySpace.VMEM)],
        out_specs=pl.BlockSpec(memory_space=pltpu.MemorySpace.VMEM),
        compiler_params=pltpu.CompilerParams(vmem_limit_bytes=VMEM_LIMIT),
    )(x2d, w_row)


# ------------------------------ JAX glue -------------------------------------

def precompute_freqs_cos_sin(dim, end, theta=10000.0, scale=1.0):
    freqs = 1.0 / (theta ** (jnp.arange(0, dim, 2)[: dim // 2].astype(jnp.float32) / dim))
    t = jnp.arange(end, dtype=jnp.float32) * scale
    ang = jnp.outer(t, freqs)
    return jnp.cos(ang), jnp.sin(ang)


def apply_rotary_emb(xq, xk, cos, sin):
    # Matches torch view_as_complex over (first-half, second-half) split.
    def rot(x):
        d = x.shape[-1] // 2
        xf = x.astype(jnp.float32)
        x1, x2 = xf[..., :d], xf[..., d:]
        c = cos[None, :, None, :]
        s = sin[None, :, None, :]
        return jnp.concatenate([x1 * c - x2 * s, x1 * s + x2 * c],
                               axis=-1).astype(x.dtype)
    return rot(xq), rot(xk)


def transformer_block(x, p, cos, sin, cfg):
    B, S, D = x.shape
    H, KVH, Dh = cfg["n_heads"], cfg["n_kv_heads"], cfg["head_dim"]
    M = B * S
    x2d = x.reshape(M, D)

    # fused RMSNorm + QKV projection (single activation read, 3 output slabs)
    qkv = rmsnorm_matmul(x2d, p["input_ln"], p["wqkv"], cfg["eps"])
    nq, nkv = H * Dh, KVH * Dh
    xq = qkv[:, :nq].reshape(B, S, H, Dh)
    xk = qkv[:, nq:nq + nkv].reshape(B, S, KVH, Dh)
    xv = qkv[:, nq + nkv:].reshape(B, S, KVH, Dh)
    xq, xk = apply_rotary_emb(xq, xk, cos, sin)
    # TODO(synk): kv-cache writes (cache_k/cache_v) omitted; they do not affect
    # the returned tensor in the non-chunked prefill path (start_pos=0).

    q = xq.transpose(0, 2, 1, 3).reshape(B * H, S, Dh)
    k = xk.transpose(0, 2, 1, 3).reshape(B * KVH, S, Dh)
    v = xv.transpose(0, 2, 1, 3).reshape(B * KVH, S, Dh)
    attn = flash_attention(q, k, v, H, KVH, 1.0 / math.sqrt(Dh))
    attn2d = attn.reshape(B, H, S, Dh).transpose(0, 2, 1, 3).reshape(M, H * Dh)

    # o-projection with fused residual add (h = x + attn @ Wo)
    h2d = linear_residual(attn2d, p["wo"], x2d)

    # fused RMSNorm + SwiGLU MLP + residual (out = h + mlp(norm(h)))
    out2d = rmsnorm_mlp(h2d, p["post_ln"], p["wg"], p["wu"], p["wd"], cfg["eps"])
    return out2d.reshape(B, S, D)


def transformer_forward(tokens, start_pos, params, cfg):
    B, S = tokens.shape
    D = cfg["hidden"]
    h = params["embed"][tokens]                            # (B, S, D) bf16
    cos = params["freqs_cos"][start_pos:start_pos + S]
    sin = params["freqs_sin"][start_pos:start_pos + S]
    # causal mask is generated inside the flash-attention kernel (seqlen>1 path)
    for lp in params["layers"]:
        h = transformer_block(h, lp, cos, sin, cfg)
    h = h[:, -1:, :]                                       # last token only
    hn = rmsnorm(h.reshape(B, D), params["final_ln"], cfg["eps"])
    return hn.reshape(B, 1, D)


# ------------------------------ parameter init --------------------------------

def init_params(key, cfg):
    D, I = cfg["hidden"], cfg["intermediate"]
    H, KVH, Dh = cfg["n_heads"], cfg["n_kv_heads"], cfg["head_dim"]
    V = cfg["vocab"]
    dt = jnp.bfloat16

    def nrm(k, shape, scale=0.05):
        return (jax.random.normal(k, shape, dtype=jnp.float32) * scale).astype(dt)

    keys = jax.random.split(key, 2 + 8 * cfg["n_layers"])
    params = {"embed": nrm(keys[0], (V, D)),
              "final_ln": jnp.ones((1, D), jnp.float32)}
    cos, sin = precompute_freqs_cos_sin(Dh, cfg["max_pos"] * 2,
                                        cfg["theta"], cfg["rope_scale"])
    params["freqs_cos"], params["freqs_sin"] = cos, sin

    layers = []
    kidx = 2
    for _ in range(cfg["n_layers"]):
        # weights stored transposed (K, N) -> MXU-native orientation
        wq = nrm(keys[kidx + 0], (D, H * Dh))
        wk = nrm(keys[kidx + 1], (D, KVH * Dh))
        wv = nrm(keys[kidx + 2], (D, KVH * Dh))
        lp = {
            "wqkv": jnp.concatenate([wq, wk, wv], axis=1),
            "wo": nrm(keys[kidx + 3], (H * Dh, D)),
            "wg": nrm(keys[kidx + 4], (D, I)),
            "wu": nrm(keys[kidx + 5], (D, I)),
            "wd": nrm(keys[kidx + 6], (I, D)),
            "input_ln": jnp.ones((1, D), jnp.float32),
            "post_ln": jnp.ones((1, D), jnp.float32),
        }
        layers.append(lp)
        kidx += 8
    params["layers"] = layers
    return params


# ------------------------------ main ------------------------------------------

if __name__ == "__main__":
    cfg = dict(
        vocab=128, hidden=32, intermediate=64,
        n_heads=4, n_kv_heads=2, head_dim=8,
        n_layers=2, max_pos=64, theta=10000.0, rope_scale=1.0, eps=1e-6,
    )
    key = jax.random.PRNGKey(0)
    pkey, tkey = jax.random.split(key)
    params = init_params(pkey, cfg)

    B, S = 2, 8
    tokens = jax.random.randint(tkey, (B, S), 0, cfg["vocab"], dtype=jnp.int32)

    out = transformer_forward(tokens, start_pos=0, params=params, cfg=cfg)
    out = jax.block_until_ready(out)
    assert out.shape == (B, 1, cfg["hidden"])
    assert bool(jnp.all(jnp.isfinite(out.astype(jnp.float32))))
    print("KERNEL_OK")
</pallas_src>

<mosaic_0001>
module attributes {stable_mosaic.version = 11 : i64} {
  func.func @_rmsnorm_matmul_kernel(%arg0: i32, %arg1: i32, %arg2: memref<16x32xbf16, #tpu.memory_space<vmem>>, %arg3: memref<1x32xf32, #tpu.memory_space<vmem>>, %arg4: memref<32x64xbf16, #tpu.memory_space<vmem>>, %arg5: memref<16x64xbf16, #tpu.memory_space<vmem>>, %arg6: memref<16x32xbf16, #tpu.memory_space<vmem>>) attributes {dimension_semantics = [#tpu.dimension_semantics<parallel>, #tpu.dimension_semantics<arbitrary>], iteration_bounds = array<i64: 1, 1>, scalar_prefetch = 0 : i64, scratch_operands = 1 : i64, tpu.core_type = #tpu.core_type<tc>, window_params = [{transform_indices = @transform_0, window_bounds = array<i64: 16, 32>}, {pipeline_mode = #tpu.pipeline_mode<synchronous>, transform_indices = @transform_1, window_bounds = array<i64: 1, 32>}, {transform_indices = @transform_2, window_bounds = array<i64: 32, 64>}, {transform_indices = @transform_3, window_bounds = array<i64: 16, 64>}]} {
    %c0_i32 = arith.constant 0 : i32
    %0 = arith.cmpi eq, %arg1, %c0_i32 : i32
    %1 = arith.extui %0 : i1 to i32
    %c0_i32_0 = arith.constant 0 : i32
    %2 = arith.cmpi ne, %1, %c0_i32_0 : i32
    scf.if %2 {
      %c0_6 = arith.constant 0 : index
      %c0_7 = arith.constant 0 : index
      %8 = vector.load %arg2[%c0_6, %c0_7] : memref<16x32xbf16, #tpu.memory_space<vmem>>, vector<16x32xbf16>
      %9 = arith.extf %8 : vector<16x32xbf16> to vector<16x32xf32>
      %10 = arith.mulf %9, %9 : vector<16x32xf32>
      %cst_8 = arith.constant dense<0.000000e+00> : vector<16xf32>
      %11 = vector.multi_reduction <add>, %10, %cst_8 [1] : vector<16x32xf32> to vector<16xf32>
      %12 = vector.shape_cast %11 : vector<16xf32> to vector<16x1xf32>
      %cst_9 = arith.constant 3.200000e+01 : f32
      %13 = vector.broadcast %cst_9 : f32 to vector<16x1xf32>
      %14 = arith.divf %12, %13 : vector<16x1xf32>
      %cst_10 = arith.constant 9.99999997E-7 : f32
      %15 = vector.broadcast %cst_10 : f32 to vector<16x1xf32>
      %16 = arith.addf %14, %15 : vector<16x1xf32>
      %17 = math.rsqrt %16 : vector<16x1xf32>
      %18 = vector.broadcast %17 : vector<16x1xf32> to vector<16x32xf32>
      %19 = arith.mulf %9, %18 : vector<16x32xf32>
      %c0_11 = arith.constant 0 : index
      %c0_12 = arith.constant 0 : index
      %20 = vector.load %arg3[%c0_11, %c0_12] : memref<1x32xf32, #tpu.memory_space<vmem>>, vector<1x32xf32>
      %21 = vector.broadcast %20 : vector<1x32xf32> to vector<16x32xf32>
      %22 = arith.mulf %19, %21 : vector<16x32xf32>
      %23 = arith.truncf %22 : vector<16x32xf32> to vector<16x32xbf16>
      %c0_13 = arith.constant 0 : index
      %c0_14 = arith.constant 0 : index
      %24 = vector.load %arg6[%c0_13, %c0_14] : memref<16x32xbf16, #tpu.memory_space<vmem>>, vector<16x32xbf16>
      tpu.vector_store %arg6[%c0_13, %c0_14], %23 {strides = array<i32>} : memref<16x32xbf16, #tpu.memory_space<vmem>>, vector<16x32xbf16>,
    } else {
    }
    %c0 = arith.constant 0 : index
    %c0_1 = arith.constant 0 : index
    %3 = vector.load %arg6[%c0, %c0_1] : memref<16x32xbf16, #tpu.memory_space<vmem>>, vector<16x32xbf16>
    %c0_2 = arith.constant 0 : index
    %c0_3 = arith.constant 0 : index
    %4 = vector.load %arg4[%c0_2, %c0_3] : memref<32x64xbf16, #tpu.memory_space<vmem>>, vector<32x64xbf16>
    %cst = arith.constant dense<0.000000e+00> : vector<16x64xf32>
    %5 = tpu.matmul %3, %4, %cst {dimension_numbers = #tpu.dot_dimension_numbers<[1], [0], [0], [1], [0, 0, 1, 1], [], []>} : vector<16x32xbf16>, vector<32x64xbf16>, vector<16x64xf32> -> vector<16x64xf32>
    %6 = arith.truncf %5 : vector<16x64xf32> to vector<16x64xbf16>
    %c0_4 = arith.constant 0 : index
    %c0_5 = arith.constant 0 : index
    %7 = vector.load %arg5[%c0_4, %c0_5] : memref<16x64xbf16, #tpu.memory_space<vmem>>, vector<16x64xbf16>
    tpu.vector_store %arg5[%c0_4, %c0_5], %6 {strides = array<i32>} : memref<16x64xbf16, #tpu.memory_space<vmem>>, vector<16x64xbf16>,
    return
  }
  func.func @transform_0(%arg0: i32, %arg1: i32) -> (i32, i32) {
    %c0_i32 = arith.constant 0 : i32
    %c0_i32_0 = arith.constant 0 : i32
    return %arg0, %c0_i32 : i32, i32
  }
  func.func @transform_1(%arg0: i32, %arg1: i32) -> (i32, i32) {
    %c0_i32 = arith.constant 0 : i32
    %c0_i32_0 = arith.constant 0 : i32
    %c0_i32_1 = arith.constant 0 : i32
    return %c0_i32, %c0_i32_0 : i32, i32
  }
  func.func @transform_2(%arg0: i32, %arg1: i32) -> (i32, i32) {
    %c0_i32 = arith.constant 0 : i32
    %c0_i32_0 = arith.constant 0 : i32
    return %c0_i32, %arg1 : i32, i32
  }
  func.func @transform_3(%arg0: i32, %arg1: i32) -> (i32, i32) {
    %c0_i32 = arith.constant 0 : i32
    return %arg0, %arg1 : i32, i32
  }
}

</mosaic_0001>

<bundles_post_ra>
// kernel: tpu_custom_call.1
= control target key start
LH: loop header
LB: loop body
LE: loop exit
PB: predicated region body
PF: predicated region fallthrough
CT: control target
= control target key end

     0   :  { %8 = vsyncpa [#allocation4], 0  ;;  %s375_s0 = inlined_call_operand.hbm [shape: bf16[16,32], index: 0, kind: input, shape index: {}]   ;;  %s376_s1 = inlined_call_operand.hbm [shape: f32[1,32], index: 1, kind: input, shape index: {}]   ;;  %s377_s2 = inlined_call_operand.hbm [shape: bf16[32,64], index: 2, kind: input, shape index: {}]   ;;  %s378_s3 = inlined_call_operand.hbm [shape: bf16[16,64], index: 3, kind: output, shape index: {}]  }
   0x1   :  { %9 = vsyncpa [#allocation7], 0  ;;  %s29_s14 = sshll.u32 %s376_s1, 4  ;;  %s30_s14 = int_to_ptr.hbm [resolvable:$true] %s29_s14 }
   0x2   :  { %10 = vsyncpa [#allocation5], 0  ;;  %s324_s15 = smov [#allocation6]   ;;  %s15_s19 = sshll.u32 %s375_s0, 4  ;;  %s16_s19 = int_to_ptr.hbm [resolvable:$true] %s15_s19 }
   0x3   :  { %s31_s16 = sshll.u32 %s324_s15, 4  ;;  %s325_s20 = smov [#allocation3]   ;;  %s32_s16 = int_to_ptr.vmem [resolvable:$true] %s31_s16 }
   0x4   :  { %34 = dma.hbm_to_vmem [thread:$0]  %s30_s14, 16, %s32_s16, [#allocation7]  }
   0x5   :  { %s17_s21 = sshll.u32 %s325_s20, 4  ;;  %s326_s22 = smov 64   ;;  %s18_s21 = int_to_ptr.vmem [resolvable:$true] %s17_s21 }
   0x6   :  { %s327_s23 = smov 4   ;;  %s39_s25 = sshll.u32 %s377_s2, 4  ;;  %s40_s25 = int_to_ptr.hbm [resolvable:$true] %s39_s25 }
   0x7   :  { %23 = dma.hbm_to_vmem [thread:$0]  %s16_s19, 128, %s18_s21, [#allocation4], %s326_s22, %s326_s22, %s327_s23  }
   0x8   :  { %s328_s26 = smov [#allocation8]  }
   0x9   :  { %s41_s27 = sshll.u32 %s328_s26, 4  ;;  %s42_s27 = int_to_ptr.vmem [resolvable:$true] %s41_s27 }
   0xa   :  { %47 = dma.hbm_to_vmem [thread:$0]  %s40_s25, 256, %s42_s27, [#allocation7], %s326_s22, %s326_s22, %s327_s23  }
   0xb   :  { %318 = dma.done.wait [#allocation4], 128  }
   0xc   :  { %319 = vsyncadd [#allocation4], 4294967168 }
   0xd   :  { %320 = dma.done.wait [#allocation7], 272  }
   0xe   :  { %321 = vsyncadd [#allocation7], 4294967024  ;;  %v205_v0 = vld [vmem:[#allocation3] sm:$0xff]   ;;  %vm71_vm0 = vcmask 261120   ;;  %v329_v7 = vmov 32.0   ;;  %v203_v17 = vld [vmem:[#allocation8 + $0x8] sm:$0xff] }
   0xf   :  { %v206_v1 = vunpack.c.l.bf16 %v205_v0  ;;  %v207_v3 = vunpack.c.h.bf16 %v205_v0  ;;  %216 = vrcp.f32 %v329_v7  ;;  %155 = vmatpush.bf16.msra.mxu0 %v203_v17  ;;  %v202_v18 = vld [vmem:[#allocation8] sm:$0xff]  ;;  %v215_v30 = vld [vmem:[#allocation6] ss:$0 sm:$0xff]  ;;  %vm119_vm5 = vcmask 257024   ;;  %s330_s0 = smov [#allocation9]   ;;  %s174_s30 = sshll.u32 %s378_s3, 4  ;;  %s175_s30 = int_to_ptr.hbm [resolvable:$true] %s174_s30 }
  0x10   :  { %vm165_vm9 = vcmask 519168   ;;  %s172_s2 = sshll.u32 %s330_s0, 4  ;;  %s173_s2 = int_to_ptr.vmem [resolvable:$true] %s172_s2 }
  0x11   :  { %v69_v2 = vmul.f32 %v206_v1, %v206_v1  ;;  %v70_v5 = vmul.f32 %v207_v3, %v207_v3 }
  0x13   :  { %v72_v4 = vsel %vm71_vm0, %v69_v2, 0.0  ;;  %v75_v6 = vsel %vm71_vm0, %v70_v5, 0.0  ;;  %156 = vmatpush.bf16.msra.mxu0 %v202_v18 }
  0x14   :  { %73 = vadd.xlane.f32.xlu0 %v72_v4 }
  0x15   :  { %v217_v8 = vpop.eup %216 }
  0x16   :  { %v79_v9 = vmul.f32 32.0, %v217_v8  ;;  %vm83_vm1 = vweird.f32 %v217_v8 }
  0x18   :  { %v80_v10 = vsub.f32 1.0, %v79_v9 }
  0x1a   :  { %v81_v11 = vmul.f32 %v217_v8, %v80_v10 }
  0x1c   :  { %76 = vadd.xlane.f32.xlu0 %v75_v6  ;;  %v82_v12 = vadd.f32 %v217_v8, %v81_v11 }
  0x1e   :  { %v84_v13 = vsel %vm83_vm1, %v217_v8, %v82_v12 }
  0x87   :  { %v74_v14 = vpop.xlane.xlu0 %73 }
  0x88   :  { %v85_v15 = vmul.f32 %v84_v13, %v74_v14 }
  0x8a   :  { %v87_v16 = vadd.f32 1e-06, %v85_v15 }
  0x8c   :  { %218 = vrsqrt.f32 %v87_v16  ;;  %vm95_vm3 = vweird.f32 %v87_v16 }
  0x8f   :  { %v77_v19 = vpop.xlane.xlu0 %76 }
  0x90   :  { %v86_v20 = vmul.f32 %v84_v13, %v77_v19 }
  0x92   :  { %v219_v21 = vpop.eup %218  ;;  %v88_v22 = vadd.f32 1e-06, %v86_v20 }
  0x93   :  { %v90_v23 = vmul.f32 %v219_v21, %v87_v16  ;;  %vm96_vm2 = vweird.f32 %v219_v21 }
  0x94   :  { %220 = vrsqrt.f32 %v88_v22  ;;  %vm97_vm4 = vmor %vm95_vm3, %vm96_vm2  ;;  %vm105_vm7 = vweird.f32 %v88_v22 }
  0x95   :  { %v91_v24 = vmul.f32 %v219_v21, %v90_v23 }
  0x97   :  { %v92_v25 = vmul.f32 0.5, %v91_v24 }
  0x99   :  { %v93_v26 = vsub.f32 1.5, %v92_v25 }
  0x9a   :  { %v221_v27 = vpop.eup %220 }
  0x9b   :  { %v94_v28 = vmul.f32 %v219_v21, %v93_v26  ;;  %v100_v29 = vmul.f32 %v221_v27, %v88_v22  ;;  %vm106_vm6 = vweird.f32 %v221_v27 }
  0x9c   :  { %vm107_vm8 = vmor %vm105_vm7, %vm106_vm6 }
  0x9d   :  { %v98_v31 = vsel %vm97_vm4, %v219_v21, %v94_v28  ;;  %v101_v32 = vmul.f32 %v221_v27, %v100_v29 }
  0x9e   :  { %v109_v33 = vmul.f32 %v206_v1, %v98_v31 }
  0x9f   :  { %v102_v34 = vmul.f32 0.5, %v101_v32 }
  0xa0   :  { %v115_v35 = vmul.f32 %v215_v30, %v109_v33 }
  0xa1   :  { %v103_v36 = vsub.f32 1.5, %v102_v34 }
  0xa2   :  { %v117_v37 = vpack.c.bf16 %v115_v35, %v115_v35 }
  0xa3   :  { %v104_v38 = vmul.f32 %v221_v27, %v103_v36 }
  0xa4   :  { %120 = vst.msk [vmem:[#allocation2] sm:$0xf] %vm119_vm5, %v117_v37 }
  0xa5   :  { %v108_v39 = vsel %vm107_vm8, %v221_v27, %v104_v38 }
  0xa6   :  { %v110_v40 = vmul.f32 %v207_v3, %v108_v39 }
  0xa8   :  { %v116_v41 = vmul.f32 %v215_v30, %v110_v40 }
  0xaa   :  { %v118_v42 = vpack.c.bf16 %v116_v41, %v116_v41 }
  0xac   :  { %121 = vst.msk [vmem:[#allocation2 + $0x4] sm:$0xf] %vm119_vm5, %v118_v42 }
  0xb3   :  { %v201_v43 = vld [vmem:[#allocation2] sm:$0xff] }
  0xb4   :  { %200 = vmatmul.msk.bf16.vlgmr.msra.gmra.mxu0 %vm71_vm0, %v201_v43 }
 0x131   :  { %v158_v44 = vpop.f32.mrf.mxu0 }
 0x132   :  { %v163_v45 = vpack.c.bf16 %v158_v44, %v158_v44 }
 0x134   :  { %166 = vst.msk [vmem:[#allocation9] sm:$0xf] %vm165_vm9, %v163_v45 }
 0x139   :  { %v160_v46 = vpop.f32.mrf.mxu0 }
 0x13a   :  { %v164_v47 = vpack.c.bf16 %v160_v46, %v160_v46 }
 0x13c   :  { %167 = vst.msk [vmem:[#allocation9 + $0x4] sm:$0xf] %vm165_vm9, %v164_v47 }
 0x13d   :  { %180 = dma.vmem_to_hbm [thread:$0]  %s173_s2, 128, %s175_s30, [#allocation5], %s326_s22, %s326_s22, %s327_s23  }
 0x13e   :  { %322 = dma.done.wait [#allocation5], 128  }
 0x13f   :  { %323 = vsyncadd [#allocation5], 4294967168 }
 0x140   :  { %185 = vsyncpa [#allocation4], 1 }
 0x141   :  { %186 = vsyncpa [#allocation7], 1 }
 0x142   :  { %187 = vsyncpa [#allocation5], 1 }

</bundles_post_ra>
